<compile_context>
chip_gen: v6e
topology: v6e:2x2x1
jax: 0.10.0
libtpu: 0.0.40
codegen_flags: <defaults>
</compile_context>

<pallas_src>
import functools

import jax
import jax.numpy as jnp
from jax.experimental import pallas as pl
from jax.experimental.pallas import tpu as pltpu


def _round_up(x, m):
    return (x + m - 1) // m * m


def _forward_step_kernel(idx_ref, xh_ref, c_ref,
                         w_lstm_ref, b_lstm_ref, w_dec_ref, b_dec_ref,
                         logits_ref, h_out_ref, c_out_ref, *, hidden_size):
    """One controller step: fused LSTMCell gate matmul + decoder[idx] Linear.

    idx_ref    : SMEM (1,) int32  scalar-prefetch decoder index (used only by
                 the w_dec/b_dec index_maps).
    xh_ref     : (B, 2H)  f32  [embed | h_prev]   (concatenated in wrapper)
    c_ref      : (B, H)   f32  previous cell state
    w_lstm_ref : (2H, 4H) bf16 [W_ih; W_hh] fused, pre-transposed
    b_lstm_ref : (1, 4H)  f32  b_ih + b_hh
    w_dec_ref  : (H, Sp)  bf16 decoder[idx] weight (pre-transposed, lane-pad)
    b_dec_ref  : (1, Sp)  f32  decoder[idx] bias   (lane-pad)
    outputs    : logits (B, Sp), h_new (B, H), c_new (B, H), all f32
    """
    del idx_ref
    H = hidden_size

    # Single fused MXU pass (bf16 inputs, f32 accumulate).
    gates = (jnp.dot(xh_ref[...].astype(jnp.bfloat16), w_lstm_ref[...],
                     preferred_element_type=jnp.float32)
             + b_lstm_ref[...])

    # PyTorch LSTMCell gate order [i, f, g, o]; slices are 128-lane aligned.
    i_g = jax.nn.sigmoid(gates[:, 0 * H:1 * H])
    f_g = jax.nn.sigmoid(gates[:, 1 * H:2 * H])
    g_g = jnp.tanh(gates[:, 2 * H:3 * H])
    o_g = jax.nn.sigmoid(gates[:, 3 * H:4 * H])

    c_new = f_g * c_ref[...] + i_g * g_g
    h_new = o_g * jnp.tanh(c_new)

    logits_ref[...] = (jnp.dot(h_new.astype(jnp.bfloat16), w_dec_ref[...],
                               preferred_element_type=jnp.float32)
                       + b_dec_ref[...])
    h_out_ref[...] = h_new
    c_out_ref[...] = c_new


def _greedy_sample_kernel(emb_ref, w_lstm_ref, b_lstm_ref, w_dec_ref, b_dec_ref,
                          logits_ref, xh_sc, c_sc,
                          *, hidden_size, search_size):
    """One grid step of the fused greedy sample() recurrence.

    grid=(num_outputs,), "arbitrary".  LSTM weights / embedding table have
    constant index_maps (fetched once); [x|h] and c persist in VMEM scratch.

    emb_ref    : (Sp, H)  bf16  embedding table, row-padded
    w_lstm_ref : (2H, 4H) bf16
    b_lstm_ref : (1, 4H)  f32
    w_dec_ref  : (H, Sp)  bf16  decoder[t]
    b_dec_ref  : (1, Sp)  f32   decoder[t]
    logits_ref : (8, Sp)  f32   per-step logits block (row 0 is real)
    xh_sc      : (1, 2H)  f32   [current embedded input | h]
    c_sc       : (1, H)   f32   cell state
    """
    t = pl.program_id(0)
    H = hidden_size
    S = search_size
    Sp = logits_ref.shape[-1]

    @pl.when(t == 0)
    def _init():
        xh_sc[...] = jnp.zeros_like(xh_sc)   # inputs = 0, h = 0
        c_sc[...] = jnp.zeros_like(c_sc)     # c = 0

    gates = (jnp.dot(xh_sc[...].astype(jnp.bfloat16), w_lstm_ref[...],
                     preferred_element_type=jnp.float32)
             + b_lstm_ref[...])
    i_g = jax.nn.sigmoid(gates[:, 0 * H:1 * H])
    f_g = jax.nn.sigmoid(gates[:, 1 * H:2 * H])
    g_g = jnp.tanh(gates[:, 2 * H:3 * H])
    o_g = jax.nn.sigmoid(gates[:, 3 * H:4 * H])
    c_new = f_g * c_sc[...] + i_g * g_g
    h_new = o_g * jnp.tanh(c_new)
    c_sc[...] = c_new
    xh_sc[:, H:2 * H] = h_new                # h half of [x|h] (lane-aligned)

    logits = (jnp.dot(h_new.astype(jnp.bfloat16), w_dec_ref[...],
                      preferred_element_type=jnp.float32)
              + b_dec_ref[...])                              # (1, Sp)
    logits_ref[...] = jnp.broadcast_to(logits, logits_ref.shape)

    # Greedy action (argmax over valid lanes, first-max tie-break) and its
    # embedding for the next step: next_x = one_hot(action) @ embedding.
    col = jax.lax.broadcasted_iota(jnp.int32, (1, Sp), 1)
    masked = jnp.where(col < S, logits, jnp.float32(-1e30))
    m = jnp.max(masked, axis=-1, keepdims=True)
    a_idx = jnp.min(jnp.where(masked >= m, col, Sp), axis=-1, keepdims=True)
    one_hot = (col == a_idx).astype(jnp.bfloat16)            # (1, Sp)
    xh_sc[:, 0:H] = jnp.dot(one_hot, emb_ref[...],
                            preferred_element_type=jnp.float32)


class ControllerPallas:
    """JAX/Pallas port of `_Controller` (forward pass + greedy sample)."""

    def __init__(self, search_size, num_outputs, hidden_size=128, seed=0):
        self.search_size = search_size
        self.num_outputs = num_outputs
        self.hidden_size = hidden_size
        self.s_pad = _round_up(search_size, 128)   # lane-dense decoder output

        H, S, N, Sp = hidden_size, search_size, num_outputs, self.s_pad
        key = jax.random.PRNGKey(seed)
        k_emb, k_wih, k_whh, k_bih, k_bhh, kd_w, kd_b = jax.random.split(key, 7)
        bound = 1.0 / float(H) ** 0.5

        # nn.Embedding(search_size, hidden_size): N(0, 1).
        self.embedding = jax.random.normal(k_emb, (S, H), jnp.float32)
        # bf16 row-padded copy for the in-kernel (one_hot @ table) lookup.
        self.embedding_pad = jnp.zeros((Sp, H), jnp.bfloat16).at[:S].set(
            self.embedding.astype(jnp.bfloat16))

        # nn.LSTMCell(H, H): U(-1/sqrt(H), 1/sqrt(H)); fused & pre-transposed
        # as [W_ih; W_hh] : (2H, 4H), stored bf16 for the MXU.
        w_ih = jax.random.uniform(k_wih, (H, 4 * H), jnp.float32, -bound, bound)
        w_hh = jax.random.uniform(k_whh, (H, 4 * H), jnp.float32, -bound, bound)
        self.w_lstm = jnp.concatenate([w_ih, w_hh], axis=0).astype(jnp.bfloat16)
        b_ih = jax.random.uniform(k_bih, (4 * H,), jnp.float32, -bound, bound)
        b_hh = jax.random.uniform(k_bhh, (4 * H,), jnp.float32, -bound, bound)
        self.b = (b_ih + b_hh).reshape(1, 4 * H)

        # num_outputs x nn.Linear(H, S): pre-transposed, lane-padded to Sp.
        w_dec = jax.random.uniform(kd_w, (N, H, S), jnp.float32, -bound, bound)
        b_dec = jax.random.uniform(kd_b, (N, 1, S), jnp.float32, -bound, bound)
        self.w_dec = jnp.zeros((N, H, Sp), jnp.bfloat16).at[:, :, :S].set(
            w_dec.astype(jnp.bfloat16))
        self.b_dec = jnp.zeros((N, 1, Sp), jnp.float32).at[:, :, :S].set(b_dec)

    # ------------------------------------------------------------------ #
    def forward(self, inputs, hidden, idx, is_embed=False):
        """Matches `_Controller.forward`: returns (logits, (h, c))."""
        if is_embed:
            embed = inputs                                    # (B, H) floats
        else:
            embed = jnp.take(self.embedding, inputs, axis=0)  # (B,) int -> (B, H)
        h, c = hidden
        B, H, S, Sp = embed.shape[0], self.hidden_size, self.search_size, self.s_pad

        xh = jnp.concatenate([embed, h], axis=-1)             # (B, 2H)
        idx_arr = jnp.asarray(idx, jnp.int32).reshape(1)      # scalar prefetch

        kernel = functools.partial(_forward_step_kernel, hidden_size=H)
        grid_spec = pltpu.PrefetchScalarGridSpec(
            num_scalar_prefetch=1,
            grid=(1,),
            in_specs=[
                pl.BlockSpec((B, 2 * H), lambda i, idx_ref: (0, 0)),        # xh
                pl.BlockSpec((B, H), lambda i, idx_ref: (0, 0)),            # c
                pl.BlockSpec((2 * H, 4 * H), lambda i, idx_ref: (0, 0)),    # W_lstm
                pl.BlockSpec((1, 4 * H), lambda i, idx_ref: (0, 0)),        # b_lstm
                pl.BlockSpec((None, H, Sp),
                             lambda i, idx_ref: (idx_ref[0], 0, 0)),        # W_dec[idx]
                pl.BlockSpec((None, 1, Sp),
                             lambda i, idx_ref: (idx_ref[0], 0, 0)),        # b_dec[idx]
            ],
            out_specs=(
                pl.BlockSpec((B, Sp), lambda i, idx_ref: (0, 0)),
                pl.BlockSpec((B, H), lambda i, idx_ref: (0, 0)),
                pl.BlockSpec((B, H), lambda i, idx_ref: (0, 0)),
            ),
        )
        logits_pad, h_new, c_new = pl.pallas_call(
            kernel,
            grid_spec=grid_spec,
            out_shape=(
                jax.ShapeDtypeStruct((B, Sp), jnp.float32),
                jax.ShapeDtypeStruct((B, H), jnp.float32),
                jax.ShapeDtypeStruct((B, H), jnp.float32),
            ),
            compiler_params=pltpu.CompilerParams(
                dimension_semantics=("arbitrary",)),
        )(idx_arr, xh, c, self.w_lstm, self.b, self.w_dec, self.b_dec)
        return logits_pad[:, :S], (h_new, c_new)

    # ------------------------------------------------------------------ #
    def sample(self, sample_best=False, key=None):
        """Greedy path (sample_best=True) is ONE fused pallas_call."""
        N, H, S, Sp = self.num_outputs, self.hidden_size, self.search_size, self.s_pad

        if not sample_best:
            # TODO(synk): multinomial sampling stays a host-side loop over the
            # single-step forward kernel (in-kernel sampling would need
            # pltpu.prng_* + a Gumbel-max draw per step).
            if key is None:
                key = jax.random.PRNGKey(0)
            inputs = jnp.zeros((1, H), jnp.float32)
            hidden = (jnp.zeros((1, H), jnp.float32),
                      jnp.zeros((1, H), jnp.float32))
            actions, log_probs = [], []
            for idx in range(N):
                logits, hidden = self.forward(inputs, hidden, idx,
                                              is_embed=(idx == 0))
                key, sub = jax.random.split(key)
                action = jax.random.categorical(sub, logits[0])
                log_probs.append(jax.nn.log_softmax(logits[0])[action])
                actions.append(action)
                inputs = action.reshape(1)
            return jnp.stack(actions), jnp.stack(log_probs)

        kernel = functools.partial(_greedy_sample_kernel,
                                   hidden_size=H, search_size=S)
        grid_spec = pltpu.PrefetchScalarGridSpec(
            num_scalar_prefetch=0,
            grid=(N,),
            in_specs=[
                pl.BlockSpec((Sp, H), lambda t: (0, 0)),          # embedding
                pl.BlockSpec((2 * H, 4 * H), lambda t: (0, 0)),   # W_lstm (resident)
                pl.BlockSpec((1, 4 * H), lambda t: (0, 0)),       # b_lstm (resident)
                pl.BlockSpec((None, H, Sp), lambda t: (t, 0, 0)),  # decoder[t] W
                pl.BlockSpec((None, 1, Sp), lambda t: (t, 0, 0)),  # decoder[t] b
            ],
            out_specs=pl.BlockSpec((None, 8, Sp), lambda t: (t, 0, 0)),
            scratch_shapes=[
                pltpu.VMEM((1, 2 * H), jnp.float32),   # [embed | h]
                pltpu.VMEM((1, H), jnp.float32),       # c
            ],
        )
        logits_all = pl.pallas_call(
            kernel,
            grid_spec=grid_spec,
            out_shape=jax.ShapeDtypeStruct((N, 8, Sp), jnp.float32),
            compiler_params=pltpu.CompilerParams(
                dimension_semantics=("arbitrary",)),
        )(self.embedding_pad, self.w_lstm, self.b, self.w_dec, self.b_dec)

        logits_all = logits_all[:, 0, :S]                      # (N, S)
        actions = jnp.argmax(logits_all, axis=-1)
        log_probs = jnp.take_along_axis(
            jax.nn.log_softmax(logits_all, axis=-1), actions[:, None], axis=-1)[:, 0]
        return actions, log_probs

    # ------------------------------------------------------------------ #
    # Pure-JAX references (same bf16-weight math) for verification.
    def forward_ref(self, inputs, hidden, idx, is_embed=False):
        embed = inputs if is_embed else jnp.take(self.embedding, inputs, axis=0)
        h, c = hidden
        H, S = self.hidden_size, self.search_size
        xh = jnp.concatenate([embed, h], axis=-1).astype(jnp.bfloat16)
        gates = jnp.dot(xh, self.w_lstm, preferred_element_type=jnp.float32) + self.b
        i_g = jax.nn.sigmoid(gates[:, 0 * H:1 * H])
        f_g = jax.nn.sigmoid(gates[:, 1 * H:2 * H])
        g_g = jnp.tanh(gates[:, 2 * H:3 * H])
        o_g = jax.nn.sigmoid(gates[:, 3 * H:4 * H])
        c_new = f_g * c + i_g * g_g
        h_new = o_g * jnp.tanh(c_new)
        logits = (jnp.dot(h_new.astype(jnp.bfloat16), self.w_dec[idx, :, :S],
                          preferred_element_type=jnp.float32)
                  + self.b_dec[idx, :, :S])
        return logits, (h_new, c_new)

    def sample_ref(self):
        N, H = self.num_outputs, self.hidden_size
        inputs = jnp.zeros((1, H), jnp.float32)
        hidden = (jnp.zeros((1, H), jnp.float32), jnp.zeros((1, H), jnp.float32))
        actions, log_probs = [], []
        for idx in range(N):
            logits, hidden = self.forward_ref(inputs, hidden, idx,
                                              is_embed=(idx == 0))
            action = jnp.argmax(logits[0])
            log_probs.append(jax.nn.log_softmax(logits[0])[action])
            actions.append(action)
            inputs = action.reshape(1)
        return jnp.stack(actions), jnp.stack(log_probs)


if __name__ == "__main__":
    search_size = 16
    num_outputs = 3
    hidden_size = 128     # module default; keeps gate slices 128-lane aligned
    batch = 2

    ctrl = ControllerPallas(search_size, num_outputs, hidden_size, seed=0)

    key = jax.random.PRNGKey(0)
    k_tok, k_emb_in = jax.random.split(key)

    h0 = jnp.zeros((batch, hidden_size), jnp.float32)
    c0 = jnp.zeros((batch, hidden_size), jnp.float32)

    # Path 1: is_embed=True (raw embedded input, like the first sample() step).
    x_embed = jax.random.normal(k_emb_in, (batch, hidden_size), jnp.float32)
    logits0, (h1, c1) = ctrl.forward(x_embed, (h0, c0), idx=0, is_embed=True)

    # Path 2: is_embed=False (integer tokens through the encoder).
    tokens = jax.random.randint(k_tok, (batch,), 0, search_size, jnp.int32)
    logits1, (h2, c2) = ctrl.forward(tokens, (h1, c1), idx=1, is_embed=False)

    # Path 3: fused greedy sample() — whole recurrence in ONE pallas_call.
    actions, log_probs = ctrl.sample(sample_best=True)

    jax.block_until_ready((logits0, logits1, h2, c2, actions, log_probs))

    # Verify against the pure-JAX references.
    r_logits0, (r_h1, r_c1) = ctrl.forward_ref(x_embed, (h0, c0), 0, True)
    r_logits1, (r_h2, r_c2) = ctrl.forward_ref(tokens, (r_h1, r_c1), 1, False)
    assert jnp.allclose(logits0, r_logits0, atol=1e-2, rtol=1e-2)
    assert jnp.allclose(logits1, r_logits1, atol=1e-2, rtol=1e-2)
    assert jnp.allclose(h2, r_h2, atol=1e-2, rtol=1e-2)
    assert jnp.allclose(c2, r_c2, atol=1e-2, rtol=1e-2)

    r_actions, r_log_probs = ctrl.sample_ref()
    assert jnp.array_equal(actions, r_actions)
    assert jnp.allclose(log_probs, r_log_probs, atol=1e-2, rtol=1e-2)

    print("KERNEL_OK")
</pallas_src>

<mosaic_0001>
module attributes {stable_mosaic.version = 11 : i64} {
  func.func @_forward_step_kernel(%arg0: i32, %arg1: memref<1xi32, #tpu.memory_space<smem>>, %arg2: memref<2x256xf32, #tpu.memory_space<vmem>>, %arg3: memref<2x128xf32, #tpu.memory_space<vmem>>, %arg4: memref<256x512xbf16, #tpu.memory_space<vmem>>, %arg5: memref<1x512xf32, #tpu.memory_space<vmem>>, %arg6: memref<1x128x128xbf16, #tpu.memory_space<vmem>>, %arg7: memref<1x1x128xf32, #tpu.memory_space<vmem>>, %arg8: memref<2x128xf32, #tpu.memory_space<vmem>>, %arg9: memref<2x128xf32, #tpu.memory_space<vmem>>, %arg10: memref<2x128xf32, #tpu.memory_space<vmem>>) attributes {dimension_semantics = [#tpu.dimension_semantics<arbitrary>], iteration_bounds = array<i64: 1>, scalar_prefetch = 1 : i64, scratch_operands = 0 : i64, tpu.core_type = #tpu.core_type<tc>, window_params = [{pipeline_mode = #tpu.pipeline_mode<synchronous>, transform_indices = @transform_0, window_bounds = array<i64: 2, 256>}, {pipeline_mode = #tpu.pipeline_mode<synchronous>, transform_indices = @transform_1, window_bounds = array<i64: 2, 128>}, {pipeline_mode = #tpu.pipeline_mode<synchronous>, transform_indices = @transform_2, window_bounds = array<i64: 256, 512>}, {pipeline_mode = #tpu.pipeline_mode<synchronous>, transform_indices = @transform_3, window_bounds = array<i64: 1, 512>}, {transform_indices = @transform_4, window_bounds = array<i64: 1, 128, 128>}, {transform_indices = @transform_5, window_bounds = array<i64: 1, 1, 128>}, {pipeline_mode = #tpu.pipeline_mode<synchronous>, transform_indices = @transform_6, window_bounds = array<i64: 2, 128>}, {pipeline_mode = #tpu.pipeline_mode<synchronous>, transform_indices = @transform_7, window_bounds = array<i64: 2, 128>}, {pipeline_mode = #tpu.pipeline_mode<synchronous>, transform_indices = @transform_8, window_bounds = array<i64: 2, 128>}]} {
    %c0 = arith.constant 0 : index
    %c0_0 = arith.constant 0 : index
    %0 = vector.load %arg2[%c0, %c0_0] : memref<2x256xf32, #tpu.memory_space<vmem>>, vector<2x256xf32>
    %1 = arith.truncf %0 : vector<2x256xf32> to vector<2x256xbf16>
    %c0_1 = arith.constant 0 : index
    %c0_2 = arith.constant 0 : index
    %2 = vector.load %arg4[%c0_1, %c0_2] : memref<256x512xbf16, #tpu.memory_space<vmem>>, vector<256x512xbf16>
    %cst = arith.constant dense<0.000000e+00> : vector<2x512xf32>
    %3 = tpu.matmul %1, %2, %cst {dimension_numbers = #tpu.dot_dimension_numbers<[1], [0], [0], [1], [0, 0, 1, 1], [], []>} : vector<2x256xbf16>, vector<256x512xbf16>, vector<2x512xf32> -> vector<2x512xf32>
    %c0_3 = arith.constant 0 : index
    %c0_4 = arith.constant 0 : index
    %4 = vector.load %arg5[%c0_3, %c0_4] : memref<1x512xf32, #tpu.memory_space<vmem>>, vector<1x512xf32>
    %5 = vector.broadcast %4 : vector<1x512xf32> to vector<2x512xf32>
    %6 = arith.addf %3, %5 : vector<2x512xf32>
    %7 = vector.extract_strided_slice %6 {offsets = [0, 0], sizes = [2, 128], strides = [1, 1]} : vector<2x512xf32> to vector<2x128xf32>
    %8 = arith.negf %7 : vector<2x128xf32>
    %9 = math.exp %8 : vector<2x128xf32>
    %cst_5 = arith.constant 1.000000e+00 : f32
    %10 = vector.broadcast %cst_5 : f32 to vector<2x128xf32>
    %11 = arith.addf %10, %9 : vector<2x128xf32>
    %12 = arith.divf %10, %11 : vector<2x128xf32>
    %13 = vector.extract_strided_slice %6 {offsets = [0, 128], sizes = [2, 128], strides = [1, 1]} : vector<2x512xf32> to vector<2x128xf32>
    %14 = arith.negf %13 : vector<2x128xf32>
    %15 = math.exp %14 : vector<2x128xf32>
    %cst_6 = arith.constant 1.000000e+00 : f32
    %16 = vector.broadcast %cst_6 : f32 to vector<2x128xf32>
    %17 = arith.addf %16, %15 : vector<2x128xf32>
    %18 = arith.divf %16, %17 : vector<2x128xf32>
    %19 = vector.extract_strided_slice %6 {offsets = [0, 256], sizes = [2, 128], strides = [1, 1]} : vector<2x512xf32> to vector<2x128xf32>
    %20 = math.tanh %19 : vector<2x128xf32>
    %21 = vector.extract_strided_slice %6 {offsets = [0, 384], sizes = [2, 128], strides = [1, 1]} : vector<2x512xf32> to vector<2x128xf32>
    %22 = arith.negf %21 : vector<2x128xf32>
    %23 = math.exp %22 : vector<2x128xf32>
    %cst_7 = arith.constant 1.000000e+00 : f32
    %24 = vector.broadcast %cst_7 : f32 to vector<2x128xf32>
    %25 = arith.addf %24, %23 : vector<2x128xf32>
    %26 = arith.divf %24, %25 : vector<2x128xf32>
    %c0_8 = arith.constant 0 : index
    %c0_9 = arith.constant 0 : index
    %27 = vector.load %arg3[%c0_8, %c0_9] : memref<2x128xf32, #tpu.memory_space<vmem>>, vector<2x128xf32>
    %28 = arith.mulf %18, %27 : vector<2x128xf32>
    %29 = arith.mulf %12, %20 : vector<2x128xf32>
    %30 = arith.addf %28, %29 : vector<2x128xf32>
    %31 = math.tanh %30 : vector<2x128xf32>
    %32 = arith.mulf %26, %31 : vector<2x128xf32>
    %33 = arith.truncf %32 : vector<2x128xf32> to vector<2x128xbf16>
    %c0_10 = arith.constant 0 : index
    %c0_11 = arith.constant 0 : index
    %c0_12 = arith.constant 0 : index
    %34 = vector.load %arg6[%c0_10, %c0_11, %c0_12] : memref<1x128x128xbf16, #tpu.memory_space<vmem>>, vector<1x128x128xbf16>
    %35 = vector.shape_cast %34 : vector<1x128x128xbf16> to vector<128x128xbf16>
    %cst_13 = arith.constant dense<0.000000e+00> : vector<2x128xf32>
    %36 = tpu.matmul %33, %35, %cst_13 {dimension_numbers = #tpu.dot_dimension_numbers<[1], [0], [0], [1], [0, 0, 1, 1], [], []>} : vector<2x128xbf16>, vector<128x128xbf16>, vector<2x128xf32> -> vector<2x128xf32>
    %c0_14 = arith.constant 0 : index
    %c0_15 = arith.constant 0 : index
    %c0_16 = arith.constant 0 : index
    %37 = vector.load %arg7[%c0_14, %c0_15, %c0_16] : memref<1x1x128xf32, #tpu.memory_space<vmem>>, vector<1x1x128xf32>
    %38 = vector.shape_cast %37 : vector<1x1x128xf32> to vector<1x128xf32>
    %39 = vector.broadcast %38 : vector<1x128xf32> to vector<2x128xf32>
    %40 = arith.addf %36, %39 : vector<2x128xf32>
    %c0_17 = arith.constant 0 : index
    %c0_18 = arith.constant 0 : index
    %41 = vector.load %arg8[%c0_17, %c0_18] : memref<2x128xf32, #tpu.memory_space<vmem>>, vector<2x128xf32>
    tpu.vector_store %arg8[%c0_17, %c0_18], %40 {strides = array<i32>} : memref<2x128xf32, #tpu.memory_space<vmem>>, vector<2x128xf32>,
    %c0_19 = arith.constant 0 : index
    %c0_20 = arith.constant 0 : index
    %42 = vector.load %arg9[%c0_19, %c0_20] : memref<2x128xf32, #tpu.memory_space<vmem>>, vector<2x128xf32>
    tpu.vector_store %arg9[%c0_19, %c0_20], %32 {strides = array<i32>} : memref<2x128xf32, #tpu.memory_space<vmem>>, vector<2x128xf32>,
    %c0_21 = arith.constant 0 : index
    %c0_22 = arith.constant 0 : index
    %43 = vector.load %arg10[%c0_21, %c0_22] : memref<2x128xf32, #tpu.memory_space<vmem>>, vector<2x128xf32>
    tpu.vector_store %arg10[%c0_21, %c0_22], %30 {strides = array<i32>} : memref<2x128xf32, #tpu.memory_space<vmem>>, vector<2x128xf32>,
    return
  }
  func.func @transform_0(%arg0: i32, %arg1: memref<1xi32, #tpu.memory_space<smem>>) -> (i32, i32) {
    %c0_i32 = arith.constant 0 : i32
    %c0_i32_0 = arith.constant 0 : i32
    %c0_i32_1 = arith.constant 0 : i32
    return %c0_i32, %c0_i32_0 : i32, i32
  }
  func.func @transform_1(%arg0: i32, %arg1: memref<1xi32, #tpu.memory_space<smem>>) -> (i32, i32) {
    %c0_i32 = arith.constant 0 : i32
    %c0_i32_0 = arith.constant 0 : i32
    %c0_i32_1 = arith.constant 0 : i32
    return %c0_i32, %c0_i32_0 : i32, i32
  }
  func.func @transform_2(%arg0: i32, %arg1: memref<1xi32, #tpu.memory_space<smem>>) -> (i32, i32) {
    %c0_i32 = arith.constant 0 : i32
    %c0_i32_0 = arith.constant 0 : i32
    %c0_i32_1 = arith.constant 0 : i32
    return %c0_i32, %c0_i32_0 : i32, i32
  }
  func.func @transform_3(%arg0: i32, %arg1: memref<1xi32, #tpu.memory_space<smem>>) -> (i32, i32) {
    %c0_i32 = arith.constant 0 : i32
    %c0_i32_0 = arith.constant 0 : i32
    %c0_i32_1 = arith.constant 0 : i32
    return %c0_i32, %c0_i32_0 : i32, i32
  }
  func.func @transform_4(%arg0: i32, %arg1: memref<1xi32, #tpu.memory_space<smem>>) -> (i32, i32, i32) {
    %c0 = arith.constant 0 : index
    %0 = memref.load %arg1[%c0] : memref<1xi32, #tpu.memory_space<smem>>
    %c0_i32 = arith.constant 0 : i32
    %c0_i32_0 = arith.constant 0 : i32
    %c0_i32_1 = arith.constant 0 : i32
    return %0, %c0_i32, %c0_i32_0 : i32, i32, i32
  }
  func.func @transform_5(%arg0: i32, %arg1: memref<1xi32, #tpu.memory_space<smem>>) -> (i32, i32, i32) {
    %c0 = arith.constant 0 : index
    %0 = memref.load %arg1[%c0] : memref<1xi32, #tpu.memory_space<smem>>
    %c0_i32 = arith.constant 0 : i32
    %c0_i32_0 = arith.constant 0 : i32
    %c0_i32_1 = arith.constant 0 : i32
    return %0, %c0_i32, %c0_i32_0 : i32, i32, i32
  }
  func.func @transform_6(%arg0: i32, %arg1: memref<1xi32, #tpu.memory_space<smem>>) -> (i32, i32) {
    %c0_i32 = arith.constant 0 : i32
    %c0_i32_0 = arith.constant 0 : i32
    %c0_i32_1 = arith.constant 0 : i32
    return %c0_i32, %c0_i32_0 : i32, i32
  }
  func.func @transform_7(%arg0: i32, %arg1: memref<1xi32, #tpu.memory_space<smem>>) -> (i32, i32) {
    %c0_i32 = arith.constant 0 : i32
    %c0_i32_0 = arith.constant 0 : i32
    %c0_i32_1 = arith.constant 0 : i32
    return %c0_i32, %c0_i32_0 : i32, i32
  }
  func.func @transform_8(%arg0: i32, %arg1: memref<1xi32, #tpu.memory_space<smem>>) -> (i32, i32) {
    %c0_i32 = arith.constant 0 : i32
    %c0_i32_0 = arith.constant 0 : i32
    %c0_i32_1 = arith.constant 0 : i32
    return %c0_i32, %c0_i32_0 : i32, i32
  }
}

</mosaic_0001>

<bundles_post_ra>
// kernel: tpu_custom_call.1
= control target key start
LH: loop header
LB: loop body
LE: loop exit
PB: predicated region body
PF: predicated region fallthrough
CT: control target
= control target key end

     0   :  { %16 = vsyncpa [#allocation5], 0  ;;  %s1291_s0 = inlined_call_operand.<no memory space> [shape: s32[1], index: 0, kind: input, shape index: {}]   ;;  %s1292_s1 = inlined_call_operand.hbm [shape: f32[2,256], index: 1, kind: input, shape index: {}]   ;;  %s1293_s2 = inlined_call_operand.hbm [shape: f32[2,128], index: 2, kind: input, shape index: {}]   ;;  %s1294_s3 = inlined_call_operand.hbm [shape: bf16[256,512], index: 3, kind: input, shape index: {}]   ;;  %s1295_s4 = inlined_call_operand.vmem [shape: f32[1,512], index: 4, kind: input, shape index: {}]   ;;  %s1296_s5 = inlined_call_operand.hbm [shape: bf16[3,128,128], index: 5, kind: input, shape index: {}]   ;;  %s1297_s6 = inlined_call_operand.vmem [shape: f32[3,1,128], index: 6, kind: input, shape index: {}]   ;;  %s1298_s7 = inlined_call_operand.hbm [shape: f32[2,128], index: 7, kind: output, shape index: {0}]   ;;  %s1299_s8 = inlined_call_operand.hbm [shape: f32[2,128], index: 8, kind: output, shape index: {1}]   ;;  %s1300_s9 = inlined_call_operand.hbm [shape: f32[2,128], index: 9, kind: output, shape index: {2}]  }
   0x1   :  { %17 = vsyncpa [#allocation8], 0 }
   0x2   :  { %18 = vsyncpa [#allocation11], 0 }
   0x3   :  { %19 = vsyncpa [#allocation6], 0 }
   0x4   :  { %20 = vsyncpa [#allocation14], 0  ;;  %s1186_s30 = smov [#allocation7]   ;;  %s1187_s11 = smov [#allocation4]  }
   0x5   :  { %s37_s10 = sshll.u32 %s1186_s30, 4  ;;  %s27_s12 = sshll.u32 %s1187_s11, 4  ;;  %s38_s10 = int_to_ptr.vmem [resolvable:$true] %s37_s10  ;;  %s28_s12 = int_to_ptr.vmem [resolvable:$true] %s27_s12 }
   0x6   :  { %s1042_s13 = scalar_lea.vmem %s38_s10, 32  ;;  %p1047_p1 = scmp.lt.s32.totalorder %s38_s10, %s38_s10 }
   0x7   :  { %p1043_p0 = scmp.ne.s32.totalorder %s38_s10, %s1042_s13  ;;  %p1048_p2 = scmp.lt.s32.totalorder %s1042_s13, %s1042_s13 }
   0x9   :  { %p1049_p3 = por %p1048_p2, %p1047_p1 }
   0xb   :  { %p1050_p4 = pnand %p1049_p3, %p1043_p0 }
   0xd   :  { %1053 = shalt.err (!%p1050_p4)
}
   0xe   :  { %40 = dma.hbm_to_vmem [thread:$0]  %s1293_s2, 32, %s38_s10, [#allocation8]  }
   0xf   :  { %s1062_s16 = scalar_lea.vmem %s28_s12, 64  ;;  %p1067_p6 = scmp.lt.s32.totalorder %s28_s12, %s28_s12 }
  0x10   :  { %p1063_p5 = scmp.ne.s32.totalorder %s28_s12, %s1062_s16  ;;  %p1068_p7 = scmp.lt.s32.totalorder %s1062_s16, %s1062_s16 }
  0x12   :  { %p1069_p8 = por %p1068_p7, %p1067_p6 }
  0x14   :  { %p1070_p9 = pnand %p1069_p8, %p1063_p5 }
  0x16   :  { %1073 = shalt.err (!%p1070_p9)
}
  0x17   :  { %30 = dma.hbm_to_vmem [thread:$0]  %s1292_s1, 64, %s28_s12, [#allocation5]  }
  0x18   :  { %s1188_s19 = smov [#allocation9]   ;;  %s871_s23 = sshll.u32 %s1291_s0, 10 }
  0x19   :  { %s46_s20 = sshll.u32 %s1188_s19, 4  ;;  %s47_s20 = int_to_ptr.vmem [resolvable:$true] %s46_s20 }
  0x1a   :  { %s1082_s24 = scalar_lea.vmem %s47_s20, 8192  ;;  %p1087_p11 = scmp.lt.s32.totalorder %s47_s20, %s47_s20 }
  0x1b   :  { %p1083_p10 = scmp.ne.s32.totalorder %s47_s20, %s1082_s24  ;;  %p1088_p12 = scmp.lt.s32.totalorder %s1082_s24, %s1082_s24 }
  0x1d   :  { %p1089_p13 = por %p1088_p12, %p1087_p11 }
  0x1f   :  { %p1090_p0 = pnand %p1089_p13, %p1083_p10 }
  0x21   :  { %1093 = shalt.err (!%p1090_p0)
}
  0x22   :  { %s1189_s2 = smov 256   ;;  %s1190_s25 = smov 16  }
  0x23   :  { %52 = dma.hbm_to_vmem [thread:$0]  %s1294_s3, 8192, %s47_s20, [#allocation8], %s1189_s2, %s1189_s2, %s1190_s25  }
  0x24   :  { %s63_s29 = scalar_lea.hbm %s1296_s5, %s871_s23  ;;  %s1191_s30 = smov [#allocation10]  }
  0x25   :  { %s64_s10 = sshll.u32 %s1191_s30, 4  ;;  %s1094_s11 = scalar_lea.hbm %s63_s29, 1024  ;;  %s65_s10 = int_to_ptr.vmem [resolvable:$true] %s64_s10 }
  0x26   :  { %p1095_p1 = scmp.ne.s32.totalorder %s63_s29, %s1094_s11  ;;  %s1096_s14 = scalar_lea.hbm %s1296_s5, 3072 }
  0x27   :  { %p1097_p2 = scmp.lt.s32.totalorder %s63_s29, %s1296_s5  ;;  %p1098_p3 = scmp.lt.s32.totalorder %s1096_s14, %s1094_s11 }
  0x29   :  { %p1099_p4 = por %p1098_p3, %p1097_p2 }
  0x2b   :  { %p1100_p5 = pnand %p1099_p4, %p1095_p1 }
  0x2d   :  { %1103 = shalt.err (!%p1100_p5)
}
  0x2e   :  { %s1104_s3 = scalar_lea.vmem %s65_s10, 1024  ;;  %p1109_p7 = scmp.lt.s32.totalorder %s65_s10, %s65_s10 }
  0x2f   :  { %p1105_p6 = scmp.ne.s32.totalorder %s65_s10, %s1104_s3  ;;  %p1110_p8 = scmp.lt.s32.totalorder %s1104_s3, %s1104_s3 }
  0x31   :  { %p1111_p9 = por %p1110_p8, %p1109_p7 }
  0x33   :  { %p1112_p10 = pnand %p1111_p9, %p1105_p6 }
  0x35   :  { %1115 = shalt.err (!%p1112_p10)
}
  0x36   :  { %s1192_s17 = smov 64   ;;  %s1193_s18 = smov 4  }
  0x37   :  { %70 = dma.hbm_to_vmem [thread:$0]  %s63_s29, 1024, %s65_s10, [#allocation11], %s1192_s17, %s1192_s17, %s1193_s18  }
  0x38   :  { %1176 = dma.done.wait [#allocation5], 64  }
  0x39   :  { %1177 = vsyncadd [#allocation5], 4294967232 }
  0x3a   :  { %1178 = dma.done.wait [#allocation8], 8224  }
  0x3b   :  { %1179 = vsyncadd [#allocation8], 4294959072 }
  0x3c   :  { %1180 = dma.done.wait [#allocation11], 1024  }
  0x3d   :  { %1181 = vsyncadd [#allocation11], 4294966272  ;;  %v914_v0 = vld [vmem:[#allocation9 + $0xe4] ss:$16 sps:$4 sm:$0xff]   ;;  %v916_v1 = vld [vmem:[#allocation9 + $0xe0] ss:$16 sps:$4 sm:$0xff]  }
  0x3e   :  { %521 = vmatprep.subr.bf16.mxu0 %v914_v0  ;;  %v917_v2 = vld [vmem:[#allocation9 + $0xc4] ss:$16 sps:$4 sm:$0xff]   ;;  %v919_v3 = vld [vmem:[#allocation9 + $0xc0] ss:$16 sps:$4 sm:$0xff]   ;;  %v925_v5 = vld [vmem:[#allocation9 + $0xec] ss:$16 sps:$4 sm:$0xff]  }
  0x3f   :  { %522 = vmatpush1.bf16.msra.mxu0 %v916_v1  ;;  %v920_v4 = vld [vmem:[#allocation9 + $0xa4] ss:$16 sps:$4 sm:$0xff]   ;;  %v928_v6 = vld [vmem:[#allocation9 + $0xe8] ss:$16 sps:$4 sm:$0xff]   ;;  %v922_v7 = vld [vmem:[#allocation9 + $0xa0] ss:$16 sps:$4 sm:$0xff]   ;;  %562 = vmatprep.subr.bf16.mxu1 %v925_v5 }
  0x40   :  { %523 = vmatprep.subr.bf16.mxu0 %v917_v2  ;;  %v923_v8 = vld [vmem:[#allocation9 + $0x84] ss:$16 sps:$4 sm:$0xff]   ;;  %563 = vmatpush1.bf16.msra.mxu1 %v928_v6  ;;  %v931_v9 = vld [vmem:[#allocation9 + $0xcc] ss:$16 sps:$4 sm:$0xff]   ;;  %v934_v10 = vld [vmem:[#allocation9 + $0xc8] ss:$16 sps:$4 sm:$0xff]  }
  0x41   :  { %564 = vmatprep.subr.bf16.mxu1 %v931_v9  ;;  %v927_v11 = vld [vmem:[#allocation9 + $0x80] ss:$16 sps:$4 sm:$0xff]   ;;  %v929_v12 = vld [vmem:[#allocation9 + $0x64] ss:$16 sps:$4 sm:$0xff]   ;;  %v937_v13 = vld [vmem:[#allocation9 + $0xac] ss:$16 sps:$4 sm:$0xff]  }
  0x42   :  { %v940_v14 = vld [vmem:[#allocation9 + $0xa8] ss:$16 sps:$4 sm:$0xff]   ;;  %v943_v15 = vld [vmem:[#allocation9 + $0x8c] ss:$16 sps:$4 sm:$0xff]   ;;  %v933_v16 = vld [vmem:[#allocation9 + $0x60] ss:$16 sps:$4 sm:$0xff]  }
  0x43   :  { %524 = vmatpush1.bf16.msra.mxu0 %v919_v3  ;;  %v935_v17 = vld [vmem:[#allocation9 + $0x44] ss:$16 sps:$4 sm:$0xff]   ;;  %v946_v18 = vld [vmem:[#allocation9 + $0x88] ss:$16 sps:$4 sm:$0xff]   ;;  %v949_v19 = vld [vmem:[#allocation9 + $0x6c] ss:$16 sps:$4 sm:$0xff]  }
  0x44   :  { %525 = vmatprep.subr.bf16.mxu0 %v920_v4  ;;  %565 = vmatpush1.bf16.msra.mxu1 %v934_v10  ;;  %v939_v20 = vld [vmem:[#allocation9 + $0x40] ss:$16 sps:$4 sm:$0xff]   ;;  %v941_v21 = vld [vmem:[#allocation9 + $0x24] ss:$16 sps:$4 sm:$0xff]   ;;  %v952_v22 = vld [vmem:[#allocation9 + $0x68] ss:$16 sps:$4 sm:$0xff]  }
  0x45   :  { %566 = vmatprep.subr.bf16.mxu1 %v937_v13  ;;  %v955_v23 = vld [vmem:[#allocation9 + $0x4c] ss:$16 sps:$4 sm:$0xff]   ;;  %v945_v24 = vld [vmem:[#allocation9 + $0x20] ss:$16 sps:$4 sm:$0xff]   ;;  %v947_v25 = vld [vmem:[#allocation9 + $0x4] ss:$16 sps:$4 sm:$0xff]   ;;  %v181_v13 = vlaneseq }
  0x46   :  { %v958_v26 = vld [vmem:[#allocation9 + $0x48] ss:$16 sps:$4 sm:$0xff]   ;;  %v961_v27 = vld [vmem:[#allocation9 + $0x2c] ss:$16 sps:$4 sm:$0xff]   ;;  %v951_v28 = vld [vmem:[#allocation9] ss:$16 sps:$4 sm:$0xff]  }
  0x47   :  { %526 = vmatpush1.bf16.msra.mxu0 %v922_v7  ;;  %v953_v29 = vld [vmem:[#allocation9 + $0x1e4] ss:$16 sps:$4 sm:$0xff]   ;;  %v964_v30 = vld [vmem:[#allocation9 + $0x28] ss:$16 sps:$4 sm:$0xff]   ;;  %v967_v31 = vld [vmem:[#allocation9 + $0xc] ss:$16 sps:$4 sm:$0xff]  }
  0x48   :  { %527 = vmatprep.subr.bf16.mxu0 %v923_v8  ;;  %567 = vmatpush1.bf16.msra.mxu1 %v940_v14  ;;  %v957_v32 = vld [vmem:[#allocation9 + $0x1e0] ss:$16 sps:$4 sm:$0xff]   ;;  %v959_v33 = vld [vmem:[#allocation9 + $0x1c4] ss:$16 sps:$4 sm:$0xff]   ;;  %v970_v34 = vld [vmem:[#allocation9 + $0x8] ss:$16 sps:$4 sm:$0xff]  }
  0x49   :  { %568 = vmatprep.subr.bf16.mxu1 %v943_v15  ;;  %v973_v35 = vld [vmem:[#allocation9 + $0x1ec] ss:$16 sps:$4 sm:$0xff]   ;;  %v963_v36 = vld [vmem:[#allocation9 + $0x1c0] ss:$16 sps:$4 sm:$0xff]   ;;  %v965_v37 = vld [vmem:[#allocation9 + $0x1a4] ss:$16 sps:$4 sm:$0xff]  }
  0x4a   :  { %v976_v38 = vld [vmem:[#allocation9 + $0x1e8] ss:$16 sps:$4 sm:$0xff]   ;;  %v979_v39 = vld [vmem:[#allocation9 + $0x1cc] ss:$16 sps:$4 sm:$0xff]   ;;  %v969_v40 = vld [vmem:[#allocation9 + $0x1a0] ss:$16 sps:$4 sm:$0xff]  }
  0x4b   :  { %528 = vmatpush1.bf16.msra.mxu0 %v927_v11  ;;  %v794_v41 = vld.sshfl [vmem:[#allocation4] sm:$0x33 pattern:$0x76325410]  ;;  %v971_v42 = vld [vmem:[#allocation9 + $0x184] ss:$16 sps:$4 sm:$0xff]  }
  0x4c   :  { %529 = vmatprep.subr.bf16.mxu0 %v929_v12  ;;  %569 = vmatpush1.bf16.msra.mxu1 %v946_v18  ;;  %v982_v43 = vld [vmem:[#allocation9 + $0x1c8] ss:$16 sps:$4 sm:$0xff]   ;;  %v110_v44 = vcombine.high %v794_v41, %v794_v41  ;;  %v975_v45 = vld [vmem:[#allocation9 + $0x180] ss:$16 sps:$4 sm:$0xff]   ;;  %v985_v46 = vld [vmem:[#allocation9 + $0x1ac] ss:$16 sps:$4 sm:$0xff]   ;;  %v113_v2 = vpack.c.bf16 %v794_v41, %v794_v41 }
  0x4d   :  { %570 = vmatprep.subr.bf16.mxu1 %v949_v19  ;;  %v977_v47 = vld [vmem:[#allocation9 + $0x164] ss:$16 sps:$4 sm:$0xff]   ;;  %v988_v48 = vld [vmem:[#allocation9 + $0x1a8] ss:$16 sps:$4 sm:$0xff]   ;;  %v991_v50 = vld [vmem:[#allocation9 + $0x18c] ss:$16 sps:$4 sm:$0xff]  }
  0x4e   :  { %v114_v49 = vpack.c.bf16 %v110_v44, %v110_v44  ;;  %v981_v51 = vld [vmem:[#allocation9 + $0x160] ss:$16 sps:$4 sm:$0xff]   ;;  %v983_v52 = vld [vmem:[#allocation9 + $0x144] ss:$16 sps:$4 sm:$0xff]   ;;  %v994_v53 = vld [vmem:[#allocation9 + $0x188] ss:$16 sps:$4 sm:$0xff]  }
  0x4f   :  { %530 = vmatpush1.bf16.msra.mxu0 %v933_v16  ;;  %v997_v54 = vld [vmem:[#allocation9 + $0x16c] ss:$16 sps:$4 sm:$0xff]   ;;  %v987_v55 = vld [vmem:[#allocation9 + $0x140] ss:$16 sps:$4 sm:$0xff]   ;;  %v989_v56 = vld [vmem:[#allocation9 + $0x124] ss:$16 sps:$4 sm:$0xff]  }
  0x50   :  { %531 = vmatprep.subr.bf16.mxu0 %v935_v17  ;;  %571 = vmatpush1.bf16.msra.mxu1 %v952_v22  ;;  %v1000_v57 = vld [vmem:[#allocation9 + $0x168] ss:$16 sps:$4 sm:$0xff]   ;;  %v1001_v58 = vld [vmem:[#allocation9 + $0x14c] ss:$16 sps:$4 sm:$0xff]   ;;  %v993_v59 = vld [vmem:[#allocation9 + $0x120] ss:$16 sps:$4 sm:$0xff]  }
  0x51   :  { %572 = vmatprep.subr.bf16.mxu1 %v955_v23  ;;  %553 = vmatprep.mubr.bf16.mxu0 %v114_v49  ;;  %v995_v60 = vld [vmem:[#allocation9 + $0x104] ss:$16 sps:$4 sm:$0xff]   ;;  %v1003_v61 = vld [vmem:[#allocation9 + $0x148] ss:$16 sps:$4 sm:$0xff]   ;;  %v1004_v62 = vld [vmem:[#allocation9 + $0x12c] ss:$16 sps:$4 sm:$0xff]  }
  0x52   :  { %594 = vmatprep.mubr.bf16.mxu1 %v114_v49  ;;  %v999_v63 = vld [vmem:[#allocation9 + $0x100] ss:$16 sps:$4 sm:$0xff]   ;;  %v1006_v0 = vld [vmem:[#allocation9 + $0x128] ss:$16 sps:$4 sm:$0xff]   ;;  %v1007_v1 = vld [vmem:[#allocation9 + $0x10c] ss:$16 sps:$4 sm:$0xff]  }
  0x53   :  { %532 = vmatpush1.bf16.msra.mxu0 %v939_v20  ;;  %v1009_v3 = vld [vmem:[#allocation9 + $0x108] ss:$16 sps:$4 sm:$0xff]   ;;  %v1194_v5 = vmov 0.0   ;;  %v1011_v6 = vld [vmem:[#allocation10 + $0x30] sm:$0xff]   ;;  %v1013_v8 = vld [vmem:[#allocation10 + $0x20] sm:$0xff]   ;;  %vm1195_vm0 = vmmov 0  }
  0x54   :  { %533 = vmatprep.subr.bf16.mxu0 %v941_v21  ;;  %573 = vmatpush1.bf16.msra.mxu1 %v958_v26  ;;  %v1010_v4 = vld [vmem:[#allocation10 + $0x38] sm:$0xff]   ;;  %v1012_v7 = vld [vmem:[#allocation10 + $0x28] sm:$0xff]   ;;  %v1015_v10 = vld [vmem:[#allocation10 + $0x10] sm:$0xff]   ;;  %v182_v14 = vshrl.u32 %v181_v13, 7 }
  0x55   :  { %574 = vmatprep.subr.bf16.mxu1 %v961_v27  ;;  %v1014_v9 = vld [vmem:[#allocation10 + $0x18] sm:$0xff]   ;;  %v1016_v11 = vld [vmem:[#allocation10 + $0x8] sm:$0xff]   ;;  %v1017_v12 = vld [vmem:[#allocation10] sm:$0xff]  }
  0x56   :  { %v183_v15 = vsub.s32 0, %v182_v14  ;;  %v179_v16 = vld [vmem:[%s1295_s4] sm:$0xf]  ;;  %v187_v17 = vsub.s32 1, %v182_v14  ;;  %v195_v26 = vsub.s32 3, %v182_v14  ;;  %s1196_s4 = smov [#allocation13]  }
  0x57   :  { %534 = vmatpush1.bf16.msra.mxu0 %v945_v24  ;;  %s759_s20 = sshll.u32 %s1196_s4, 4  ;;  %s760_s20 = int_to_ptr.vmem [resolvable:$true] %s759_s20 }
  0x58   :  { %535 = vmatprep.subr.bf16.mxu0 %v947_v25  ;;  %575 = vmatpush1.bf16.msra.mxu1 %v964_v30  ;;  %v184_v18 = vrot.slane %v179_v16, %v183_v15  ;;  %v188_v19 = vrot.slane %v179_v16, %v187_v17  ;;  %v191_v30 = vsub.s32 2, %v182_v14  ;;  %s1116_s21 = scalar_lea.vmem %s760_s20, 32  ;;  %p1121_p12 = scmp.lt.s32.totalorder %s760_s20, %s760_s20 }
  0x59   :  { %576 = vmatprep.subr.bf16.mxu1 %v967_v31  ;;  %p1117_p11 = scmp.ne.s32.totalorder %s760_s20, %s1116_s21  ;;  %p1122_p13 = scmp.lt.s32.totalorder %s1116_s21, %s1116_s21 }
  0x5b   :  { %536 = vmatpush1.bf16.msra.mxu0 %v951_v28  ;;  %p1123_p0 = por %p1122_p13, %p1121_p12 }
  0x5c   :  { %537 = vmatprep.subr.bf16.mxu0 %v953_v29  ;;  %577 = vmatpush1.bf16.msra.mxu1 %v970_v34  ;;  %v192_v34 = vrot.slane %v179_v16, %v191_v30 }
  0x5d   :  { %578 = vmatprep.subr.bf16.mxu1 %v973_v35  ;;  %p1124_p1 = pnand %p1123_p0, %p1117_p11 }
  0x5f   :  { %538 = vmatpush2.bf16.msra.mxu0 %v957_v32  ;;  %v196_v32 = vrot.slane %v179_v16, %v195_v26 }
  0x60   :  { %539 = vmatprep.subr.bf16.mxu0 %v959_v33  ;;  %579 = vmatpush2.bf16.msra.mxu1 %v976_v38 }
  0x61   :  { %580 = vmatprep.subr.bf16.mxu1 %v979_v39 }
  0x63   :  { %540 = vmatpush2.bf16.msra.mxu0 %v963_v36 }
  0x64   :  { %541 = vmatprep.subr.bf16.mxu0 %v965_v37  ;;  %581 = vmatpush2.bf16.msra.mxu1 %v982_v43 }
  0x65   :  { %582 = vmatprep.subr.bf16.mxu1 %v985_v46  ;;  %v622_v46 = vld [vmem:[#allocation7] sm:$0x3] }
  0x67   :  { %542 = vmatpush2.bf16.msra.mxu0 %v969_v40 }
  0x68   :  { %543 = vmatprep.subr.bf16.mxu0 %v971_v42  ;;  %583 = vmatpush2.bf16.msra.mxu1 %v988_v48 }
  0x69   :  { %584 = vmatprep.subr.bf16.mxu1 %v991_v50 }
  0x6b   :  { %544 = vmatpush2.bf16.msra.mxu0 %v975_v45 }
  0x6c   :  { %545 = vmatprep.subr.bf16.mxu0 %v977_v47  ;;  %585 = vmatpush2.bf16.msra.mxu1 %v994_v53 }
  0x6d   :  { %586 = vmatprep.subr.bf16.mxu1 %v997_v54 }
  0x6f   :  { %546 = vmatpush2.bf16.msra.mxu0 %v981_v51 }
  0x70   :  { %547 = vmatprep.subr.bf16.mxu0 %v983_v52  ;;  %587 = vmatpush2.bf16.msra.mxu1 %v1000_v57 }
  0x71   :  { %588 = vmatprep.subr.bf16.mxu1 %v1001_v58 }
  0x73   :  { %548 = vmatpush2.bf16.msra.mxu0 %v987_v55 }
  0x74   :  { %549 = vmatprep.subr.bf16.mxu0 %v989_v56  ;;  %589 = vmatpush2.bf16.msra.mxu1 %v1003_v61 }
  0x75   :  { %590 = vmatprep.subr.bf16.mxu1 %v1004_v62 }
  0x77   :  { %550 = vmatpush2.bf16.msra.mxu0 %v993_v59 }
  0x78   :  { %551 = vmatprep.subr.bf16.mxu0 %v995_v60  ;;  %591 = vmatpush2.bf16.msra.mxu1 %v1006_v0 }
  0x79   :  { %592 = vmatprep.subr.bf16.mxu1 %v1007_v1 }
  0x7b   :  { %552 = vmatpush2.bf16.msra.mxu0 %v999_v63 }
  0x7c   :  { %593 = vmatpush2.bf16.msra.mxu1 %v1009_v3  ;;  %881 = vmatprep.subr.bf16.mxu0 %v1194_v5 }
  0x7e   :  { %554 = vmatmul.mubr.bf16.vlgmr.msra.gmra.mxu0 %v113_v2 }
  0x7f   :  { %595 = vmatmul.mubr.bf16.vlgmr.msra.gmra.mxu1 %v113_v2  ;;  %882 = vmatpush3.bf16.msra.mxu0 %v1010_v4 }
  0x80   :  { %883 = vmatprep.subr.bf16.mxu0 %v1194_v5  ;;  %897 = vmatprep.mubr.msk.bf16.mxu0 %vm1195_vm0, %v1194_v5 }
  0x83   :  { %884 = vmatpush3.bf16.msra.mxu0 %v1011_v6 }
  0x84   :  { %885 = vmatprep.subr.bf16.mxu0 %v1194_v5 }
  0x87   :  { %886 = vmatpush3.bf16.msra.mxu0 %v1012_v7 }
  0x88   :  { %887 = vmatprep.subr.bf16.mxu0 %v1194_v5 }
  0x8b   :  { %888 = vmatpush3.bf16.msra.mxu0 %v1013_v8 }
  0x8c   :  { %889 = vmatprep.subr.bf16.mxu0 %v1194_v5 }
  0x8f   :  { %890 = vmatpush3.bf16.msra.mxu0 %v1014_v9 }
  0x90   :  { %891 = vmatprep.subr.bf16.mxu0 %v1194_v5 }
  0x93   :  { %892 = vmatpush3.bf16.msra.mxu0 %v1015_v10 }
  0x94   :  { %893 = vmatprep.subr.bf16.mxu0 %v1194_v5 }
  0x97   :  { %894 = vmatpush3.bf16.msra.mxu0 %v1016_v11 }
  0x98   :  { %895 = vmatprep.subr.bf16.mxu0 %v1194_v5 }
  0x9b   :  { %896 = vmatpush3.bf16.msra.mxu0 %v1017_v12 }
 0x13e   :  { %v555_v20 = vpop.f32.mrf.mxu0 }
 0x13f   :  { %v556_v21 = vadd.f32 %v555_v20, %v184_v18  ;;  %v596_v28 = vpop.f32.mrf.mxu1 }
 0x140   :  { %v557_v22 = vpop.f32.mrf.mxu0  ;;  %v597_v37 = vadd.f32 %v596_v28, %v192_v34 }
 0x141   :  { %v859_v23 = vmul.f32 -1.442695, %v556_v21  ;;  %v558_v24 = vadd.f32 %v557_v22, %v188_v19  ;;  %v598_v31 = vpop.f32.mrf.mxu1 }
 0x142   :  { %v559_v25 = vpop.f32.mrf.mxu0  ;;  %v599_v36 = vadd.f32 %v598_v31, %v196_v32 }
 0x143   :  { %1018 = vpow2.f32 %v859_v23  ;;  %v860_v27 = vmul.f32 -1.442695, %v558_v24  ;;  %v600_v33 = vpop.f32.mrf.mxu1 }
 0x144   :  { %v560_v29 = vpop.f32.mrf.mxu0  ;;  %v861_v38 = vmul.f32 -1.442695, %v599_v36 }
 0x145   :  { %1020 = vpow2.f32 %v860_v27  ;;  %v601_v35 = vpop.f32.mrf.mxu1 }
 0x146   :  { %1022 = vtanh.f32 %v597_v37 }
 0x147   :  { %1024 = vpow2.f32 %v861_v38 }
 0x150   :  { %v1019_v39 = vpop.eup %1018 }
 0x151   :  { %v606_v40 = vadd.f32 1.0, %v1019_v39 }
 0x152   :  { %v1021_v41 = vpop.eup %1020 }
 0x153   :  { %1026 = vrcp.f32 %v606_v40  ;;  %v612_v42 = vadd.f32 1.0, %v1021_v41  ;;  %v1023_v43 = vpop.eup %1022 }
 0x154   :  { %v1025_v44 = vpop.eup %1024 }
 0x155   :  { %1028 = vrcp.f32 %v612_v42  ;;  %v619_v48 = vadd.f32 1.0, %v1025_v44 }
 0x157   :  { %1030 = vrcp.f32 %v619_v48 }
 0x160   :  { %v1027_v45 = vpop.eup %1026 }
 0x161   :  { %v624_v50 = vmul.f32 %v1027_v45, %v1023_v43 }
 0x162   :  { %v1029_v47 = vpop.eup %1028 }
 0x163   :  { %v623_v49 = vmul.f32 %v1029_v47, %v622_v46 }
 0x164   :  { %v1031_v52 = vpop.eup %1030 }
 0x165   :  { %v625_v51 = vadd.f32 %v624_v50, %v623_v49 }
 0x167   :  { %1032 = vtanh.f32 %v625_v51  ;;  %742 = vst [vmem:[#allocation15] sm:$0x3] %v625_v51 }
 0x174   :  { %v1033_v53 = vpop.eup %1032 }
 0x175   :  { %v627_v54 = vmul.f32 %v1033_v53, %v1031_v52 }
 0x177   :  { %v628_v55 = vpack.c.bf16 %v627_v54, %v627_v54  ;;  %741 = vst [vmem:[#allocation13] sm:$0x3] %v627_v54 }
 0x179   :  { %898 = vmatmul.mubr.bf16.vlgmr.msra.gmra.mxu0 %v628_v55 }
 0x17a   :  { %1127 = shalt.err (!%p1124_p1)
}
 0x17b   :  { %762 = dma.vmem_to_hbm [thread:$0]  %s760_s20, 32, %s1299_s8, [#allocation14]  }
 0x17c   :  { %s1197_s24 = smov [#allocation15]  }
 0x17d   :  { %s769_s2 = sshll.u32 %s1197_s24, 4  ;;  %s770_s2 = int_to_ptr.vmem [resolvable:$true] %s769_s2 }
 0x17e   :  { %s1136_s25 = scalar_lea.vmem %s770_s2, 32  ;;  %p1141_p3 = scmp.lt.s32.totalorder %s770_s2, %s770_s2 }
 0x17f   :  { %p1137_p2 = scmp.ne.s32.totalorder %s770_s2, %s1136_s25  ;;  %p1142_p4 = scmp.lt.s32.totalorder %s1136_s25, %s1136_s25 }
 0x181   :  { %p1143_p5 = por %p1142_p4, %p1141_p3 }
 0x183   :  { %p1144_p6 = pnand %p1143_p5, %p1137_p2 }
 0x185   :  { %1147 = shalt.err (!%p1144_p6)
}
 0x186   :  { %772 = dma.vmem_to_hbm [thread:$0]  %s770_s2, 32, %s1300_s9, [#allocation14]  }
 0x187   :  { %p96_p7 = scmp.lt.s32.totalorder %s1291_s0, 2  ;;  %s1198_s12 = smov [#allocation12]  }
 0x188   :  { %s749_s13 = sshll.u32 %s1198_s12, 4  ;;  %s750_s13 = int_to_ptr.vmem [resolvable:$true] %s749_s13 }
 0x189   :  { %s1302_s0 = smov (!%p96_p7, %s1291_s0), 2  ;;  %s1156_s9 = scalar_lea.vmem %s750_s13, 32 }
 0x18a   :  { %s98_s11 = scalar_lea.vmem %s1297_s6, %s1302_s0  ;;  %p1157_p8 = scmp.ne.s32.totalorder %s750_s13, %s1156_s9 }
 0x18b   :  { %v862_v56 = vld [vmem:[%s98_s11] ss:$0 sm:$0xff]  ;;  %p1161_p9 = scmp.lt.s32.totalorder %s750_s13, %s750_s13  ;;  %p1162_p10 = scmp.lt.s32.totalorder %s1156_s9, %s1156_s9 }
 0x18d   :  { %p1163_p11 = por %p1162_p10, %p1161_p9 }
 0x18f   :  { %p1164_p12 = pnand %p1163_p11, %p1157_p8 }
 0x239   :  { %v734_v57 = vpop.f32.mrf.mxu0 }
 0x23a   :  { %v735_v58 = vadd.f32 %v862_v56, %v734_v57 }
 0x23b   :  { %v899_v59 = vpop.f32.mrf.mxu0 }
 0x23c   :  { %740 = vst [vmem:[#allocation12] sm:$0x3] %v735_v58 }
 0x23d   :  { %v737_v60 = vpop.f32.mrf.mxu0 }
 0x23e   :  { %1167 = shalt.err (!%p1164_p12)
}
 0x23f   :  { %752 = dma.vmem_to_hbm [thread:$0]  %s750_s13, 32, %s1298_s7, [#allocation6]   ;;  %v900_v61 = vpop.f32.mrf.mxu0 }
 0x240   :  { %1182 = dma.done.wait [#allocation6], 32  }
 0x241   :  { %1183 = vsyncadd [#allocation6], 4294967264 }
 0x242   :  { %1184 = dma.done.wait [#allocation14], 64  }
 0x243   :  { %1185 = vsyncadd [#allocation14], 4294967232 }
 0x244   :  { %782 = vsyncpa [#allocation5], 1 }
 0x245   :  { %783 = vsyncpa [#allocation8], 1 }
 0x246   :  { %784 = vsyncpa [#allocation11], 1 }
 0x247   :  { %785 = vsyncpa [#allocation6], 1 }
 0x248   :  { %786 = vsyncpa [#allocation14], 1 }

</bundles_post_ra>
